<compile_context>
chip_gen: v6e
topology: v6e:2x2x1
jax: 0.10.0
libtpu: 0.0.40
codegen_flags: <defaults>
</compile_context>

<pallas_src>
import math

import jax
import jax.numpy as jnp
from jax.experimental import pallas as pl
from jax.experimental.pallas import tpu as pltpu


def _flip_kernel(sign_ref, x_ref, o_ref):
    # sign_ref: (1, Db) with -1 in the lane holding feature 0, +1 elsewhere.
    # x_ref / o_ref: (Rb, Db) tile.  Broadcast multiply = copy + sign flip.
    o_ref[...] = x_ref[...] * sign_ref[...]


def random_horizontal_flip(sequences, *, target_block_bytes=8 << 20, min_row_steps=4):
    """Functional equivalent of RandomHorizontalFlip.forward: out[..., 0] = -x[..., 0]."""
    orig_shape = sequences.shape
    dtype = sequences.dtype
    D = int(orig_shape[-1])
    R = int(math.prod(orig_shape[:-1])) if len(orig_shape) > 1 else 1

    itemsize = jnp.dtype(dtype).itemsize
    sublane = max(8, 32 // itemsize)  # packed min sublane tile: 8 f32, 16 bf16, 32 i8

    # Lane (last-dim) blocking: keep the full feature dim unless it is very wide and
    # 128-aligned, in which case tile it (ragged last column block is fine).
    if D > 2048 and D % 128 == 0:
        Db = 2048
    else:
        Db = D
    grid_cols = pl.cdiv(D, Db)

    # Row blocking: ~target_block_bytes per step, rounded to the sublane tile, and
    # capped so the (parallel) row axis has >= min_row_steps steps when possible.
    row_bytes = Db * itemsize
    rb = max(sublane, (target_block_bytes // row_bytes) // sublane * sublane)
    if R >= min_row_steps * sublane:
        rb = min(rb, max(sublane, (pl.cdiv(R, min_row_steps) // sublane) * sublane))
    rb = min(rb, pl.cdiv(R, sublane) * sublane)  # never (much) larger than the array
    Rb = int(rb)
    grid_rows = pl.cdiv(R, Rb)

    x2 = sequences.reshape(R, D)  # free: only collapses leading dims
    sign = jnp.where(jnp.arange(D) == 0, -1, 1).astype(dtype).reshape(1, D)

    block_bytes = Rb * Db * itemsize
    needed = 4 * block_bytes + (2 << 20)  # double-buffered in + out, plus slack
    vmem_limit = min(48 << 20, needed) if needed > (16 << 20) else None

    out2 = pl.pallas_call(
        _flip_kernel,
        out_shape=jax.ShapeDtypeStruct((R, D), dtype),
        grid=(grid_rows, grid_cols),
        in_specs=[
            pl.BlockSpec((1, Db), lambda i, j: (0, j)),    # sign row (revisited)
            pl.BlockSpec((Rb, Db), lambda i, j: (i, j)),   # data tile
        ],
        out_specs=pl.BlockSpec((Rb, Db), lambda i, j: (i, j)),
        compiler_params=pltpu.CompilerParams(
            dimension_semantics=("parallel", "parallel"),
            vmem_limit_bytes=vmem_limit),
        cost_estimate=pl.CostEstimate(
            flops=R * D,
            bytes_accessed=2 * R * D * itemsize + D * itemsize,
            transcendentals=0),
    )(sign, x2)

    return out2.reshape(orig_shape)


if __name__ == "__main__":
    key = jax.random.PRNGKey(0)
    B, T, D = 2, 90, 32
    x = jax.random.normal(key, (B, T, D), dtype=jnp.float32)

    out = jax.jit(random_horizontal_flip)(x)
    out = jax.block_until_ready(out)

    # Reference: negate feature channel 0, keep everything else identical.
    ref = x.at[..., 0].set(-x[..., 0])
    assert out.shape == x.shape and out.dtype == x.dtype
    assert bool(jnp.allclose(out[..., 0], -x[..., 0]))
    assert bool(jnp.allclose(out[..., 1:], x[..., 1:]))
    assert bool(jnp.allclose(out, ref))
    # Input must be untouched (clone semantics).
    assert bool(jnp.allclose(x[..., 0], jax.random.normal(key, (B, T, D))[..., 0]))
    print("KERNEL_OK")
</pallas_src>

<mosaic_0001>
module attributes {stable_mosaic.version = 11 : i64} {
  func.func @_flip_kernel(%arg0: i32, %arg1: i32, %arg2: memref<1x32xf32, #tpu.memory_space<vmem>>, %arg3: memref<40x32xf32, #tpu.memory_space<vmem>>, %arg4: memref<40x32xf32, #tpu.memory_space<vmem>>) attributes {dimension_semantics = [#tpu.dimension_semantics<parallel>, #tpu.dimension_semantics<parallel>], iteration_bounds = array<i64: 5, 1>, scalar_prefetch = 0 : i64, scratch_operands = 0 : i64, tpu.core_type = #tpu.core_type<tc>, window_params = [{transform_indices = @transform_0, window_bounds = array<i64: 1, 32>}, {transform_indices = @transform_1, window_bounds = array<i64: 40, 32>}, {transform_indices = @transform_2, window_bounds = array<i64: 40, 32>}]} {
    %c0 = arith.constant 0 : index
    %c0_0 = arith.constant 0 : index
    %0 = vector.load %arg3[%c0, %c0_0] : memref<40x32xf32, #tpu.memory_space<vmem>>, vector<40x32xf32>
    %c0_1 = arith.constant 0 : index
    %c0_2 = arith.constant 0 : index
    %1 = vector.load %arg2[%c0_1, %c0_2] : memref<1x32xf32, #tpu.memory_space<vmem>>, vector<1x32xf32>
    %2 = vector.broadcast %1 : vector<1x32xf32> to vector<40x32xf32>
    %3 = arith.mulf %0, %2 : vector<40x32xf32>
    %c0_3 = arith.constant 0 : index
    %c0_4 = arith.constant 0 : index
    %4 = vector.load %arg4[%c0_3, %c0_4] : memref<40x32xf32, #tpu.memory_space<vmem>>, vector<40x32xf32>
    tpu.vector_store %arg4[%c0_3, %c0_4], %3 {strides = array<i32>} : memref<40x32xf32, #tpu.memory_space<vmem>>, vector<40x32xf32>,
    return
  }
  func.func @transform_0(%arg0: i32, %arg1: i32) -> (i32, i32) {
    %c0_i32 = arith.constant 0 : i32
    %c0_i32_0 = arith.constant 0 : i32
    return %c0_i32, %arg1 : i32, i32
  }
  func.func @transform_1(%arg0: i32, %arg1: i32) -> (i32, i32) {
    %c0_i32 = arith.constant 0 : i32
    return %arg0, %arg1 : i32, i32
  }
  func.func @transform_2(%arg0: i32, %arg1: i32) -> (i32, i32) {
    %c0_i32 = arith.constant 0 : i32
    return %arg0, %arg1 : i32, i32
  }
}

</mosaic_0001>

<bundles_post_ra>
// kernel: random_horizontal_flip.1
= control target key start
LH: loop header
LB: loop body
LE: loop exit
PB: predicated region body
PF: predicated region fallthrough
CT: control target
= control target key end

     0   :  { %s737_s9 = smov 0   ;;  %s739_s10 = smov 0   ;;  %s856_s0 = inlined_call_operand.vmem [shape: f32[1,32], index: 0, kind: input, shape index: {}]   ;;  %s857_s1 = inlined_call_operand.vmem [shape: f32[180,32], index: 1, kind: input, shape index: {}]   ;;  %s858_s2 = inlined_call_operand.vmem [shape: f32[180,32], index: 2, kind: output, shape index: {}]  }
   0x1   :  { %s741_s11 = smov 0   ;;  %s743_s12 = smov 0  }
   0x2   :  { %s745_s13 = smov 0  }
   0x3 LB: > { %s487_s14 = sadd.s32 4294967295, %s688_s13   ;;  %s24_s15 = sadd.s32 1, %s684_s12  ;;  %s688_s13 = sphi %s745_s13, %s12_s13   ;;  %s684_s12 = sphi %s743_s12, %s866_s12   ;;  %s680_s11 = sphi %s741_s11, %s865_s11   ;;  %s676_s10 = sphi %s739_s10, %s864_s10   ;;  %s672_s9 = sphi %s737_s9, %s863_s9  }
   0x4   : > { %p26_p0 = scmp.ge.s32.totalorder %s24_s15, 5  ;;  %s87_s16 = sadd.s32 1, %s676_s10 }
   0x5   : > { %p97_p1 = scmp.ne.s32.totalorder %s676_s10, %s672_s9  ;;  %p98_p2 = scmp.eq.s32.totalorder %s487_s14, 4 }
   0x6   : > { %s868_s15 = smov (%p26_p0, %s24_s15), 0  ;;  %p492_p4 = scmp.ge.s32.totalorder %s688_s13, 1 }
   0x7   : > { %p766_p3 = por %p98_p2, %p97_p1  ;;  %s82_s18 = ssub.s32 %s684_s12, %s868_s15 }
   0x8   : > { %p148_p5 = scmp.lt.s32.totalorder %s688_s13, 6  ;;  %p85_p6 = scmp.eq.s32.totalorder %s82_s18, 0 }
   0xa   : > { %p149_p7 = pnand %p492_p4, %p148_p5 }
   0xb   : > { %s775_s19 = scalar_select %p85_p6, %s676_s10, %s87_s16  }
   0xc   : > { %152 = sbr.rel (%p149_p7) target bundleno = 80 (0x50), region = 28  ;;  %s176_s20 = sand.u32 (!%p149_p7), 1, %s672_s9  }
   0xd   : > { %s778_s21 = smul.u32 (!%p149_p7), 5, %s680_s11 }
   0xe   : > { %s508_s22 = smul.u32 (!%p149_p7), 40, %s176_s20 }
   0xf   : > { %p187_p8 = scmp.lt.s32.totalorder (!%p149_p7), %s778_s21, 22 }
  0x10   : > { %s788_s30 = scalar_lea.vmem (!%p149_p7), [#allocation2], %s508_s22  }
  0x11   : > { %s188_s23 = scalar_select %p187_p8, %s778_s21, 22  ;;  %v494_v0 = vld [vmem:[%s856_s0] ss:$0 sm:$0xff]  ;;  %vm221_vm0 = vcmask 261120  }
  0x12   : > { %s235_s3 = ssub.s32 (%p766_p3), 23, %s778_s21  ;;  %s507_s4 = smul.u32 (%p766_p3), 40, %s680_s11 }
  0x13   : > { %s493_s24 = sshll.u32 %s188_s23, 3  ;;  %p236_p9 = scmp.lt.s32.totalorder (%p766_p3), %s235_s3, 5 }
  0x14   : > { %s193_s29 = scalar_lea.vmem %s857_s1, %s493_s24  ;;  %s802_s7 = scalar_lea.vmem (%p766_p3), %s858_s2, %s507_s4  }
  0x15   : > { %v204_v1 = vld [vmem:[%s193_s29] sm:$0xff]  ;;  %v205_v2 = vld [vmem:[%s193_s29 + $0x8] sm:$0xff]  ;;  %v206_v3 = vld [vmem:[%s193_s29 + $0x10] sm:$0xff] }
  0x16   : > { %v216_v4 = vmul.f32 %v494_v0, %v204_v1  ;;  %v217_v5 = vmul.f32 %v494_v0, %v205_v2  ;;  %v218_v6 = vmul.f32 %v494_v0, %v206_v3  ;;  %v207_v7 = vld [vmem:[%s193_s29 + $0x18] sm:$0xff]  ;;  %v208_v8 = vld [vmem:[%s193_s29 + $0x20] sm:$0xff]  ;;  %233 = sbr.rel (!%p766_p3) target bundleno = 80 (0x50), region = 32 }
  0x17   : > { %v219_v9 = vmul.f32 %v494_v0, %v207_v7  ;;  %v220_v10 = vmul.f32 %v494_v0, %v208_v8 }
  0x18   : > { %222 = vst.msk [vmem:[%s788_s30] sm:$0xff] %vm221_vm0, %v216_v4  ;;  %223 = vst.msk [vmem:[%s788_s30 + $0x8] sm:$0xff] %vm221_vm0, %v217_v5 }
  0x19   : > { %224 = vst.msk [vmem:[%s788_s30 + $0x10] sm:$0xff] %vm221_vm0, %v218_v6  ;;  %225 = vst.msk [vmem:[%s788_s30 + $0x18] sm:$0xff] %vm221_vm0, %v219_v9 }
  0x1a   : > { %226 = vst.msk [vmem:[%s788_s30 + $0x20] sm:$0xff] %vm221_vm0, %v220_v10 }
  0x1b   : > { %s870_s3 = smov (!%p236_p9, %s235_s3), 5 }
  0x1c   : > { %s495_s8 = sshll.u32 %s870_s3, 7 }
  0x1d   : > { %p498_p10 = scmp.eq.s32.totalorder %s495_s8, 0 }
  0x1e   : > { %614 = sdivrem.u32 (!%p498_p10), %s870_s3, 5 }
  0x1f   : > { %245 = sbr.rel (%p498_p10) target bundleno = 80 (0x50), region = 36 }
  0x27   : > { %s808_s9 = spop.drf %614 }
  0x28   : > { %p499_p11 = scmp.le.s32.totalorder %s808_s9, 0 }
  0x29   : > { %s860_s11 = smov (!%p499_p11), %s802_s7  ;;  %s861_s14 = smov (!%p499_p11), %s788_s30 }
  0x2a   : > { %426 = sbr.rel (%p499_p11) target bundleno = 55 (0x37), region = 115  ;;  %s817_s16 = smov (!%p499_p11), 0  }
  0x2b   : > { %s819_s17 = smov (!%p499_p11), 0  }
  0x2f LB: >> { %v318_v11 = vld [vmem:[%s696_s14] sm:$0xff]  ;;  %v320_v12 = vld [vmem:[%s696_s14 + $0x8] sm:$0xff]  ;;  %v322_v13 = vld [vmem:[%s696_s14 + $0x10] sm:$0xff]  ;;  %s328_s18 = sadd.s32 1, %s700_s16  ;;  %s312_s17 = sadd.s32 1, %s704_s17   ;;  %s704_s17 = sphi %s819_s17, %s312_s17   ;;  %s700_s16 = sphi %s817_s16, %s862_s16   ;;  %s696_s14 = sphi %s861_s14, %s333_s14   ;;  %s692_s11 = sphi %s860_s11, %s334_s11  }
  0x30   : >> { %319 = vst [vmem:[%s692_s11] sm:$0xff] %v318_v11  ;;  %321 = vst [vmem:[%s692_s11 + $0x8] sm:$0xff] %v320_v12  ;;  %v324_v14 = vld [vmem:[%s696_s14 + $0x18] sm:$0xff]  ;;  %v326_v15 = vld [vmem:[%s696_s14 + $0x20] sm:$0xff]  ;;  %p329_p12 = scmp.ge.s32.totalorder %s328_s18, %s808_s9  ;;  %p311_p13 = scmp.ge.s32.totalorder %s312_s17, %s808_s9 }
  0x31   : >> { %323 = vst [vmem:[%s692_s11 + $0x10] sm:$0xff] %v322_v13  ;;  %325 = vst [vmem:[%s692_s11 + $0x18] sm:$0xff] %v324_v14 }
  0x32   : >> { %327 = vst [vmem:[%s692_s11 + $0x20] sm:$0xff] %v326_v15  ;;  %s872_s18 = smov (%p329_p12, %s328_s18), 0  ;;  %314 = sbr.rel (!%p311_p13) target bundleno = 47 (0x2f), region = 121 }
  0x33   : >> { %s331_s20 = smul.u32 40, %s872_s18  ;;  %s862_s16 = smov %s872_s18 }
  0x35   : >> { %s333_s14 = scalar_lea.vmem %s788_s30, %s331_s20 [#allocation2]   ;;  %s334_s11 = scalar_lea.vmem %s802_s7, %s331_s20  }
  0x37 PF: > { %616 = sdivrem.u32 %s870_s3, 5 }
  0x38   : > { %s500_s21 = smul.u32 40, %s808_s9 }
  0x3a   : > { %s339_s22 = scalar_lea.vmem %s788_s30, %s500_s21 [#allocation2]   ;;  %s341_s23 = scalar_lea.vmem %s802_s7, %s500_s21  }
  0x40   : > { %s617_s24 = spop.drf %616 }
  0x41   : > { %p502_p0 = scmp.le.s32.totalorder %s617_s24, 0 }
  0x42   : > { %s706_s25 = smov (!%p502_p0), %s341_s23   ;;  %s710_s26 = smov (!%p502_p0), %s339_s22  }
  0x43   : > { %440 = sbr.rel (%p502_p0) target bundleno = 80 (0x50), region = 126  ;;  %s714_s27 = smov (!%p502_p0), 0  }
  0x44   : > { %s718_s28 = smov (!%p502_p0), 0  }
  0x48 LB: >> { %v351_v16 = vld [vmem:[%s712_s26] sm:$0xff]  ;;  %s353_s29 = sadd.s32 1, %s716_s27  ;;  %s345_s28 = sadd.s32 1, %s720_s28   ;;  %s720_s28 = sphi %s718_s28, %s345_s28   ;;  %s716_s27 = sphi %s714_s27, %s715_s27   ;;  %s712_s26 = sphi %s710_s26, %s358_s26   ;;  %s708_s25 = sphi %s706_s25, %s359_s25  }
  0x49   : >> { %352 = vst [vmem:[%s708_s25] sm:$0xff] %v351_v16  ;;  %p354_p1 = scmp.ge.s32.totalorder %s353_s29, %s617_s24  ;;  %p344_p2 = scmp.ge.s32.totalorder %s345_s28, %s617_s24 }
  0x4b   : >> { %s874_s29 = smov (%p354_p1, %s353_s29), 0  ;;  %347 = sbr.rel (!%p344_p2) target bundleno = 72 (0x48), region = 132 }
  0x4c   : >> { %s503_s30 = sshll.u32 %s874_s29, 3  ;;  %s715_s27 = smov %s874_s29  }
  0x4d   : >> { %s358_s26 = scalar_lea.vmem %s339_s22, %s503_s30 [#allocation2]   ;;  %s359_s25 = scalar_lea.vmem %s341_s23, %s503_s30  }
  0x50 PF: > { %s12_s13 = sadd.s32 1, %s688_s13   ;;  %s863_s9 = smov %s676_s10 }
  0x51   : > { %p9_p3 = scmp.ge.s32.totalorder %s12_s13, 7   ;;  %s864_s10 = smov %s775_s19 }
  0x52   : > { %s865_s11 = smov %s684_s12  ;;  %s866_s12 = smov %s868_s15 }
  0x53   :  { %11 = sbr.rel (!%p9_p3) target bundleno = 3 (0x3), region = 143 }

</bundles_post_ra>
